<compile_context>
chip_gen: v6e
topology: v6e:2x2x1
jax: 0.10.0
libtpu: 0.0.40
codegen_flags: <defaults>
</compile_context>

<pallas_src>
import functools

import jax
import jax.numpy as jnp
from jax.experimental import pallas as pl
from jax.experimental.pallas import tpu as pltpu


def _round_up(x, m):
    return ((x + m - 1) // m) * m


def _ce_rows(logits, onehot):
    """Per-row cross entropy: logsumexp(logits) - <onehot, logits>.  [TB, 1]"""
    m = jnp.max(logits, axis=1, keepdims=True)
    lse = m + jnp.log(jnp.sum(jnp.exp(logits - m), axis=1, keepdims=True))
    sel = jnp.sum(onehot * logits, axis=1, keepdims=True)
    return lse - sel


def hard_dist_kernel(x_ref, w_ref, b_ref, cls_ref, dist_ref, lab_ref,
                     base_ref, teach_ref, acc_ref,
                     *, batch_size, tile_b, tile_d, n_d):
    b_pid = pl.program_id(0)
    d_pid = pl.program_id(1)

    # Teacher partial matmul for this contraction step.  x arrives in its
    # original dtype (no wrapper round trip); W is fully VMEM-resident, so the
    # per-step bf16 cast of its slice is cheap VPU work hidden under the
    # (HBM-bound) x DMA.  MXU accumulates in f32.
    x_bf = x_ref[...].astype(jnp.bfloat16)
    if n_d == 1:
        w_bf = w_ref[...].astype(jnp.bfloat16)
    else:
        d0 = pl.multiple_of(d_pid * tile_d, tile_d)
        w_bf = w_ref[pl.ds(d0, tile_d), :].astype(jnp.bfloat16)
    part = jnp.dot(x_bf, w_bf, preferred_element_type=jnp.float32)   # [TB, K]

    row = jax.lax.broadcasted_iota(jnp.int32, (tile_b, 1), 0)
    row_valid = (b_pid * tile_b + row) < batch_size       # mask padded batch rows

    @pl.when(d_pid == 0)
    def _first_step():
        # Fold the bias here and write directly: no separate zero-init of the
        # accumulator (saves a full [TB, K] VMEM write + read per batch tile).
        acc_ref[...] = part + b_ref[...]
        # Base CE (cls logits + given labels) has no dependence on the teacher
        # matmul: compute it on the first contraction step so the exp/log
        # epilogue is spread across grid steps instead of serializing on the
        # last one.
        cls = cls_ref[...]
        col = jax.lax.broadcasted_iota(jnp.int32, cls.shape, 1)
        onehot = (col == lab_ref[...]).astype(jnp.float32)
        base_ref[...] = jnp.where(row_valid, _ce_rows(cls, onehot), 0.0)

    @pl.when(d_pid != 0)
    def _accumulate():
        acc_ref[...] += part

    @pl.when(d_pid == n_d - 1)
    def _last_step():
        t_logits = acc_ref[...]                            # [TB, K] f32 (bias in)
        col = jax.lax.broadcasted_iota(jnp.int32, t_logits.shape, 1)
        # Hard teacher label = argmax over classes (first index on ties).
        t_max = jnp.max(t_logits, axis=1, keepdims=True)
        cand = jnp.where(t_logits >= t_max, col, t_logits.shape[1])
        t_idx = jnp.min(cand, axis=1, keepdims=True)       # [TB, 1]
        onehot = (col == t_idx).astype(jnp.float32)
        teach_ref[...] = jnp.where(row_valid,
                                   _ce_rows(dist_ref[...], onehot), 0.0)


def hard_dist_loss(inputs_nchw, teacher_w, teacher_b, outputs_cls, outputs_dist,
                   labels, *, tb=256, td=2048):
    """inputs_nchw: [B,C,H,W]; teacher_w: [D,K]; teacher_b: [1,K] or [K];
    outputs_cls/outputs_dist: [B,K]; labels: [B] int. Returns scalar f32."""
    B = inputs_nchw.shape[0]
    D, K = teacher_w.shape
    x = inputs_nchw.reshape(B, -1)
    assert x.shape[1] == D, (x.shape, D)

    tb = _round_up(tb, 8)
    td = _round_up(td, 128)

    # ---- batch tiling ------------------------------------------------------
    TB = min(tb, _round_up(B, 8))
    # v7x megacore: make sure the "parallel" batch axis has >= 2 tiles when the
    # batch is big enough to split (otherwise one TensorCore idles).
    if B >= 16 and _round_up(B, TB) == TB:
        TB = _round_up(-(-B // 2), 8)
    B_pad = _round_up(B, TB)
    nb = B_pad // TB

    # ---- contraction tiling over D ------------------------------------------
    # Prefer tilings that need no padding of x so the (largest) array can be
    # streamed straight from HBM without a wrapper-side copy.
    if D <= td:
        TD, D_pad = D, D
    elif D % td == 0:
        TD, D_pad = td, D
    else:
        TD, D_pad = td, _round_up(D, td)   # fallback: pads x once (extra copy)
    nd = D_pad // TD

    # ---- operands (no copies when already aligned; no bf16 wrapper casts) ---
    def pad2d(a, rows, cols, dtype):
        a = a.astype(dtype)
        if a.shape == (rows, cols):
            return a
        return jnp.pad(a, ((0, rows - a.shape[0]), (0, cols - a.shape[1])))

    x_p = pad2d(x, B_pad, D_pad, x.dtype)             # streamed; cast in-kernel
    w_p = pad2d(teacher_w, D_pad, K, jnp.float32)     # VMEM-resident, 1 DMA total
    b_p = teacher_b.reshape(1, K).astype(jnp.float32)
    cls_p = pad2d(outputs_cls, B_pad, K, jnp.float32)
    dist_p = pad2d(outputs_dist, B_pad, K, jnp.float32)
    lab_p = pad2d(labels.reshape(B, 1), B_pad, 1, jnp.int32)

    # ---- VMEM budget: raise the scoped limit above the 16/32 MiB defaults,
    #      but never above v7x's 64 MiB physical VMEM. ------------------------
    x_bytes = jnp.dtype(x_p.dtype).itemsize
    vmem_est = (2 * TB * TD * x_bytes          # x tiles (double buffered)
                + 2 * D_pad * K * 4            # resident W (conservative x2)
                + 2 * 2 * TB * K * 4           # cls + dist tiles
                + 2 * TB * 4                   # labels
                + TB * K * 4                   # f32 accumulator scratch
                + 4 * TB * 4)                  # per-row CE outputs
    vmem_limit = int(min(max(2 * vmem_est, 32 << 20), 64 << 20))

    kernel = functools.partial(hard_dist_kernel, batch_size=B, tile_b=TB,
                               tile_d=TD, n_d=nd)

    base_rows, teach_rows = pl.pallas_call(
        kernel,
        out_shape=(jax.ShapeDtypeStruct((B_pad, 1), jnp.float32),
                   jax.ShapeDtypeStruct((B_pad, 1), jnp.float32)),
        grid_spec=pltpu.PrefetchScalarGridSpec(
            num_scalar_prefetch=0,
            grid=(nb, nd),
            in_specs=[
                pl.BlockSpec((TB, TD), lambda b, d: (b, d)),    # x tile (streamed)
                pl.BlockSpec((D_pad, K), lambda b, d: (0, 0)),  # W: resident, 1 fetch
                pl.BlockSpec((1, K), lambda b, d: (0, 0)),      # bias
                pl.BlockSpec((TB, K), lambda b, d: (b, 0)),     # cls logits
                pl.BlockSpec((TB, K), lambda b, d: (b, 0)),     # dist logits
                pl.BlockSpec((TB, 1), lambda b, d: (b, 0)),     # labels
            ],
            out_specs=[
                pl.BlockSpec((TB, 1), lambda b, d: (b, 0)),     # per-row base CE
                pl.BlockSpec((TB, 1), lambda b, d: (b, 0)),     # per-row teacher CE
            ],
            scratch_shapes=[pltpu.VMEM((TB, K), jnp.float32)],
        ),
        compiler_params=pltpu.CompilerParams(
            dimension_semantics=("parallel", "arbitrary"),
            vmem_limit_bytes=vmem_limit),
    )(x_p, w_p, b_p, cls_p, dist_p, lab_p)

    base_loss = jnp.sum(base_rows) / B        # padded rows contribute 0
    teacher_loss = jnp.sum(teach_rows) / B
    return 0.5 * base_loss + 0.5 * teacher_loss


def _reference(inputs_nchw, teacher_w, teacher_b, outputs_cls, outputs_dist, labels):
    """Pure-JAX reference.  The teacher matmul is done in bf16 (f32 accum) to
    match the kernel's in-VMEM cast — a documented fidelity choice; the hard
    argmax label is robust to it except on exact ties."""
    B = inputs_nchw.shape[0]
    x = inputs_nchw.reshape(B, -1).astype(jnp.bfloat16)
    w = teacher_w.astype(jnp.bfloat16)
    t_logits = jnp.dot(x, w, preferred_element_type=jnp.float32) + \
        teacher_b.reshape(1, -1).astype(jnp.float32)
    t_lab = jnp.argmax(t_logits, axis=1)

    def ce(logits, lab):
        logits = logits.astype(jnp.float32)
        lse = jax.nn.logsumexp(logits, axis=1)
        sel = jnp.take_along_axis(logits, lab[:, None], axis=1)[:, 0]
        return jnp.mean(lse - sel)

    return 0.5 * ce(outputs_cls, labels) + 0.5 * ce(outputs_dist, t_lab)


if __name__ == "__main__":
    key = jax.random.PRNGKey(0)
    k_x, k_w, k_b, k_cls, k_dist, k_lab = jax.random.split(key, 6)

    B, C, H, W = 8, 4, 16, 16
    D = C * H * W
    K = 16  # number of classes

    inputs = jax.random.normal(k_x, (B, C, H, W), dtype=jnp.float32)
    teacher_w = jax.random.normal(k_w, (D, K), dtype=jnp.float32) * 0.02
    teacher_b = jax.random.normal(k_b, (1, K), dtype=jnp.float32) * 0.02
    outputs_cls = jax.random.normal(k_cls, (B, K), dtype=jnp.float32)
    outputs_dist = jax.random.normal(k_dist, (B, K), dtype=jnp.float32)
    labels = jax.random.randint(k_lab, (B,), 0, K, dtype=jnp.int32)

    # td=512 so the demo (D=1024) exercises the multi-step contraction path
    # with the VMEM-resident teacher weight.
    loss = hard_dist_loss(inputs, teacher_w, teacher_b, outputs_cls,
                          outputs_dist, labels, td=512)
    loss = jax.block_until_ready(loss)

    ref = _reference(inputs, teacher_w, teacher_b, outputs_cls, outputs_dist, labels)
    assert jnp.allclose(loss, ref, atol=1e-4, rtol=1e-4), (loss, ref)

    print("KERNEL_OK")
</pallas_src>

<mosaic_0001>
module attributes {stable_mosaic.version = 11 : i64} {
  func.func @hard_dist_kernel(%arg0: i32, %arg1: i32, %arg2: memref<8x512xf32, #tpu.memory_space<vmem>>, %arg3: memref<1024x16xf32, #tpu.memory_space<vmem>>, %arg4: memref<1x16xf32, #tpu.memory_space<vmem>>, %arg5: memref<8x16xf32, #tpu.memory_space<vmem>>, %arg6: memref<8x16xf32, #tpu.memory_space<vmem>>, %arg7: memref<8x1xi32, #tpu.memory_space<vmem>>, %arg8: memref<8x1xf32, #tpu.memory_space<vmem>>, %arg9: memref<8x1xf32, #tpu.memory_space<vmem>>, %arg10: memref<8x16xf32, #tpu.memory_space<vmem>>) attributes {dimension_semantics = [#tpu.dimension_semantics<parallel>, #tpu.dimension_semantics<arbitrary>], iteration_bounds = array<i64: 1, 2>, scalar_prefetch = 0 : i64, scratch_operands = 1 : i64, tpu.core_type = #tpu.core_type<tc>, window_params = [{transform_indices = @transform_0, window_bounds = array<i64: 8, 512>}, {pipeline_mode = #tpu.pipeline_mode<synchronous>, transform_indices = @transform_1, window_bounds = array<i64: 1024, 16>}, {pipeline_mode = #tpu.pipeline_mode<synchronous>, transform_indices = @transform_2, window_bounds = array<i64: 1, 16>}, {transform_indices = @transform_3, window_bounds = array<i64: 8, 16>}, {transform_indices = @transform_4, window_bounds = array<i64: 8, 16>}, {transform_indices = @transform_5, window_bounds = array<i64: 8, 1>}, {transform_indices = @transform_6, window_bounds = array<i64: 8, 1>}, {transform_indices = @transform_7, window_bounds = array<i64: 8, 1>}]} {
    %c0 = arith.constant 0 : index
    %c0_0 = arith.constant 0 : index
    %0 = vector.load %arg2[%c0, %c0_0] : memref<8x512xf32, #tpu.memory_space<vmem>>, vector<8x512xf32>
    %1 = arith.truncf %0 : vector<8x512xf32> to vector<8x512xbf16>
    %c512_i32 = arith.constant 512 : i32
    %2 = arith.muli %arg1, %c512_i32 : i32
    %3 = tpu.assume_multiple %2, 512 : i32
    %4 = arith.index_cast %3 : i32 to index
    %c0_1 = arith.constant 0 : index
    %5 = vector.load %arg3[%4, %c0_1] : memref<1024x16xf32, #tpu.memory_space<vmem>>, vector<512x16xf32>
    %6 = arith.truncf %5 : vector<512x16xf32> to vector<512x16xbf16>
    %cst = arith.constant dense<0.000000e+00> : vector<8x16xf32>
    %7 = tpu.matmul %1, %6, %cst {dimension_numbers = #tpu.dot_dimension_numbers<[1], [0], [0], [1], [0, 0, 1, 1], [], []>} : vector<8x512xbf16>, vector<512x16xbf16>, vector<8x16xf32> -> vector<8x16xf32>
    %8 = tpu.iota {dimensions = array<i32: 0>} : vector<8x1xi32>
    %c8_i32 = arith.constant 8 : i32
    %9 = arith.muli %arg0, %c8_i32 : i32
    %10 = vector.broadcast %9 : i32 to vector<8x1xi32>
    %11 = arith.addi %10, %8 : vector<8x1xi32>
    %c8_i32_2 = arith.constant 8 : i32
    %12 = vector.broadcast %c8_i32_2 : i32 to vector<8x1xi32>
    %13 = arith.cmpi slt, %11, %12 : vector<8x1xi32>
    %c0_i32 = arith.constant 0 : i32
    %14 = arith.cmpi eq, %arg1, %c0_i32 : i32
    %15 = arith.extui %14 : i1 to i32
    %c0_i32_3 = arith.constant 0 : i32
    %16 = arith.cmpi ne, %15, %c0_i32_3 : i32
    scf.if %16 {
      %c0_7 = arith.constant 0 : index
      %c0_8 = arith.constant 0 : index
      %23 = vector.load %arg4[%c0_7, %c0_8] : memref<1x16xf32, #tpu.memory_space<vmem>>, vector<1x16xf32>
      %24 = vector.broadcast %23 : vector<1x16xf32> to vector<8x16xf32>
      %25 = arith.addf %7, %24 : vector<8x16xf32>
      %c0_9 = arith.constant 0 : index
      %c0_10 = arith.constant 0 : index
      %26 = vector.load %arg10[%c0_9, %c0_10] : memref<8x16xf32, #tpu.memory_space<vmem>>, vector<8x16xf32>
      tpu.vector_store %arg10[%c0_9, %c0_10], %25 {strides = array<i32>} : memref<8x16xf32, #tpu.memory_space<vmem>>, vector<8x16xf32>,
      %c0_11 = arith.constant 0 : index
      %c0_12 = arith.constant 0 : index
      %27 = vector.load %arg5[%c0_11, %c0_12] : memref<8x16xf32, #tpu.memory_space<vmem>>, vector<8x16xf32>
      %28 = tpu.iota {dimensions = array<i32: 1>} : vector<8x16xi32>
      %c0_13 = arith.constant 0 : index
      %c0_14 = arith.constant 0 : index
      %29 = vector.load %arg7[%c0_13, %c0_14] : memref<8x1xi32, #tpu.memory_space<vmem>>, vector<8x1xi32>
      %30 = vector.broadcast %29 : vector<8x1xi32> to vector<8x16xi32>
      %31 = arith.cmpi eq, %28, %30 : vector<8x16xi32>
      %32 = arith.extui %31 : vector<8x16xi1> to vector<8x16xi32>
      %33 = arith.sitofp %32 : vector<8x16xi32> to vector<8x16xf32>
      %cst_15 = arith.constant dense<0xFF800000> : vector<8xf32>
      %34 = vector.multi_reduction <maximumf>, %27, %cst_15 [1] : vector<8x16xf32> to vector<8xf32>
      %35 = vector.shape_cast %34 : vector<8xf32> to vector<8x1xf32>
      %36 = vector.broadcast %35 : vector<8x1xf32> to vector<8x16xf32>
      %37 = arith.subf %27, %36 : vector<8x16xf32>
      %38 = math.exp %37 : vector<8x16xf32>
      %cst_16 = arith.constant dense<0.000000e+00> : vector<8xf32>
      %39 = vector.multi_reduction <add>, %38, %cst_16 [1] : vector<8x16xf32> to vector<8xf32>
      %40 = vector.shape_cast %39 : vector<8xf32> to vector<8x1xf32>
      %41 = math.log %40 : vector<8x1xf32>
      %42 = arith.addf %35, %41 : vector<8x1xf32>
      %43 = arith.mulf %33, %27 : vector<8x16xf32>
      %cst_17 = arith.constant dense<0.000000e+00> : vector<8xf32>
      %44 = vector.multi_reduction <add>, %43, %cst_17 [1] : vector<8x16xf32> to vector<8xf32>
      %45 = vector.shape_cast %44 : vector<8xf32> to vector<8x1xf32>
      %46 = arith.subf %42, %45 : vector<8x1xf32>
      %cst_18 = arith.constant 0.000000e+00 : f32
      %47 = vector.broadcast %cst_18 : f32 to vector<8x1xf32>
      %48 = arith.select %13, %46, %47 : vector<8x1xi1>, vector<8x1xf32>
      %c0_19 = arith.constant 0 : index
      %c0_20 = arith.constant 0 : index
      %49 = vector.load %arg8[%c0_19, %c0_20] : memref<8x1xf32, #tpu.memory_space<vmem>>, vector<8x1xf32>
      tpu.vector_store %arg8[%c0_19, %c0_20], %48 {strides = array<i32>} : memref<8x1xf32, #tpu.memory_space<vmem>>, vector<8x1xf32>,
    } else {
    }
    %c0_i32_4 = arith.constant 0 : i32
    %17 = arith.cmpi ne, %arg1, %c0_i32_4 : i32
    %18 = arith.extui %17 : i1 to i32
    %c0_i32_5 = arith.constant 0 : i32
    %19 = arith.cmpi ne, %18, %c0_i32_5 : i32
    scf.if %19 {
      %c0_7 = arith.constant 0 : index
      %c0_8 = arith.constant 0 : index
      %23 = vector.load %arg10[%c0_7, %c0_8] : memref<8x16xf32, #tpu.memory_space<vmem>>, vector<8x16xf32>
      %24 = arith.addf %23, %7 : vector<8x16xf32>
      %c0_9 = arith.constant 0 : index
      %c0_10 = arith.constant 0 : index
      %25 = vector.load %arg10[%c0_9, %c0_10] : memref<8x16xf32, #tpu.memory_space<vmem>>, vector<8x16xf32>
      tpu.vector_store %arg10[%c0_9, %c0_10], %24 {strides = array<i32>} : memref<8x16xf32, #tpu.memory_space<vmem>>, vector<8x16xf32>,
    } else {
    }
    %c1_i32 = arith.constant 1 : i32
    %20 = arith.cmpi eq, %arg1, %c1_i32 : i32
    %21 = arith.extui %20 : i1 to i32
    %c0_i32_6 = arith.constant 0 : i32
    %22 = arith.cmpi ne, %21, %c0_i32_6 : i32
    scf.if %22 {
      %c0_7 = arith.constant 0 : index
      %c0_8 = arith.constant 0 : index
      %23 = vector.load %arg10[%c0_7, %c0_8] : memref<8x16xf32, #tpu.memory_space<vmem>>, vector<8x16xf32>
      %24 = tpu.iota {dimensions = array<i32: 1>} : vector<8x16xi32>
      %cst_9 = arith.constant dense<0xFF800000> : vector<8xf32>
      %25 = vector.multi_reduction <maximumf>, %23, %cst_9 [1] : vector<8x16xf32> to vector<8xf32>
      %26 = vector.shape_cast %25 : vector<8xf32> to vector<8x1xf32>
      %27 = vector.broadcast %26 : vector<8x1xf32> to vector<8x16xf32>
      %28 = arith.cmpf oge, %23, %27 : vector<8x16xf32>
      %c16_i32 = arith.constant 16 : i32
      %29 = vector.broadcast %c16_i32 : i32 to vector<8x16xi32>
      %30 = arith.select %28, %24, %29 : vector<8x16xi1>, vector<8x16xi32>
      %cst_10 = arith.constant dense<2147483647> : vector<8xi32>
      %31 = vector.multi_reduction <minsi>, %30, %cst_10 [1] : vector<8x16xi32> to vector<8xi32>
      %32 = vector.shape_cast %31 : vector<8xi32> to vector<8x1xi32>
      %33 = vector.broadcast %32 : vector<8x1xi32> to vector<8x16xi32>
      %34 = arith.cmpi eq, %24, %33 : vector<8x16xi32>
      %35 = arith.extui %34 : vector<8x16xi1> to vector<8x16xi32>
      %36 = arith.sitofp %35 : vector<8x16xi32> to vector<8x16xf32>
      %c0_11 = arith.constant 0 : index
      %c0_12 = arith.constant 0 : index
      %37 = vector.load %arg6[%c0_11, %c0_12] : memref<8x16xf32, #tpu.memory_space<vmem>>, vector<8x16xf32>
      %cst_13 = arith.constant dense<0xFF800000> : vector<8xf32>
      %38 = vector.multi_reduction <maximumf>, %37, %cst_13 [1] : vector<8x16xf32> to vector<8xf32>
      %39 = vector.shape_cast %38 : vector<8xf32> to vector<8x1xf32>
      %40 = vector.broadcast %39 : vector<8x1xf32> to vector<8x16xf32>
      %41 = arith.subf %37, %40 : vector<8x16xf32>
      %42 = math.exp %41 : vector<8x16xf32>
      %cst_14 = arith.constant dense<0.000000e+00> : vector<8xf32>
      %43 = vector.multi_reduction <add>, %42, %cst_14 [1] : vector<8x16xf32> to vector<8xf32>
      %44 = vector.shape_cast %43 : vector<8xf32> to vector<8x1xf32>
      %45 = math.log %44 : vector<8x1xf32>
      %46 = arith.addf %39, %45 : vector<8x1xf32>
      %47 = arith.mulf %36, %37 : vector<8x16xf32>
      %cst_15 = arith.constant dense<0.000000e+00> : vector<8xf32>
      %48 = vector.multi_reduction <add>, %47, %cst_15 [1] : vector<8x16xf32> to vector<8xf32>
      %49 = vector.shape_cast %48 : vector<8xf32> to vector<8x1xf32>
      %50 = arith.subf %46, %49 : vector<8x1xf32>
      %cst_16 = arith.constant 0.000000e+00 : f32
      %51 = vector.broadcast %cst_16 : f32 to vector<8x1xf32>
      %52 = arith.select %13, %50, %51 : vector<8x1xi1>, vector<8x1xf32>
      %c0_17 = arith.constant 0 : index
      %c0_18 = arith.constant 0 : index
      %53 = vector.load %arg9[%c0_17, %c0_18] : memref<8x1xf32, #tpu.memory_space<vmem>>, vector<8x1xf32>
      tpu.vector_store %arg9[%c0_17, %c0_18], %52 {strides = array<i32>} : memref<8x1xf32, #tpu.memory_space<vmem>>, vector<8x1xf32>,
    } else {
    }
    return
  }
  func.func @transform_0(%arg0: i32, %arg1: i32) -> (i32, i32) {
    %c0_i32 = arith.constant 0 : i32
    return %arg0, %arg1 : i32, i32
  }
  func.func @transform_1(%arg0: i32, %arg1: i32) -> (i32, i32) {
    %c0_i32 = arith.constant 0 : i32
    %c0_i32_0 = arith.constant 0 : i32
    %c0_i32_1 = arith.constant 0 : i32
    return %c0_i32, %c0_i32_0 : i32, i32
  }
  func.func @transform_2(%arg0: i32, %arg1: i32) -> (i32, i32) {
    %c0_i32 = arith.constant 0 : i32
    %c0_i32_0 = arith.constant 0 : i32
    %c0_i32_1 = arith.constant 0 : i32
    return %c0_i32, %c0_i32_0 : i32, i32
  }
  func.func @transform_3(%arg0: i32, %arg1: i32) -> (i32, i32) {
    %c0_i32 = arith.constant 0 : i32
    %c0_i32_0 = arith.constant 0 : i32
    return %arg0, %c0_i32 : i32, i32
  }
  func.func @transform_4(%arg0: i32, %arg1: i32) -> (i32, i32) {
    %c0_i32 = arith.constant 0 : i32
    %c0_i32_0 = arith.constant 0 : i32
    return %arg0, %c0_i32 : i32, i32
  }
  func.func @transform_5(%arg0: i32, %arg1: i32) -> (i32, i32) {
    %c0_i32 = arith.constant 0 : i32
    %c0_i32_0 = arith.constant 0 : i32
    return %arg0, %c0_i32 : i32, i32
  }
  func.func @transform_6(%arg0: i32, %arg1: i32) -> (i32, i32) {
    %c0_i32 = arith.constant 0 : i32
    %c0_i32_0 = arith.constant 0 : i32
    return %arg0, %c0_i32 : i32, i32
  }
  func.func @transform_7(%arg0: i32, %arg1: i32) -> (i32, i32) {
    %c0_i32 = arith.constant 0 : i32
    %c0_i32_0 = arith.constant 0 : i32
    return %arg0, %c0_i32 : i32, i32
  }
}

</mosaic_0001>

<bundles_post_ra>
// kernel: tpu_custom_call.1
= control target key start
LH: loop header
LB: loop body
LE: loop exit
PB: predicated region body
PF: predicated region fallthrough
CT: control target
= control target key end

     0   :  { %s971_s24 = smov 0   ;;  %s973_s25 = smov 0   ;;  %s1123_s0 = inlined_call_operand.vmem [shape: f32[8,1024], index: 0, kind: input, shape index: {}]   ;;  %s1124_s1 = inlined_call_operand.vmem [shape: f32[1024,16], index: 1, kind: input, shape index: {}]   ;;  %s1125_s2 = inlined_call_operand.vmem [shape: f32[1,16], index: 2, kind: input, shape index: {}]   ;;  %s1126_s3 = inlined_call_operand.vmem [shape: f32[8,16], index: 3, kind: input, shape index: {}]   ;;  %s1127_s4 = inlined_call_operand.vmem [shape: f32[8,16], index: 4, kind: input, shape index: {}]   ;;  %s1128_s5 = inlined_call_operand.vmem [shape: s32[8,1], index: 5, kind: input, shape index: {}]   ;;  %s1129_s6 = inlined_call_operand.vmem [shape: f32[8,1], index: 6, kind: output, shape index: {0}]   ;;  %s1130_s7 = inlined_call_operand.vmem [shape: f32[8,1], index: 7, kind: output, shape index: {1}]  }
   0x1   :  { %s975_s26 = smov 0  }
   0x2 LB: > { %s27_s27 = sadd.s32 1, %s922_s25  ;;  %p810_p0 = scmp.ge.s32.totalorder %s926_s26, 1  ;;  %s926_s26 = sphi %s975_s26, %s18_s26   ;;  %s922_s25 = sphi %s973_s25, %s1133_s25   ;;  %s918_s24 = sphi %s971_s24, %s1132_s24  }
   0x3   : > { %p28_p1 = scmp.ge.s32.totalorder %s27_s27, 2  ;;  %p286_p2 = scmp.lt.s32.totalorder %s926_s26, 3 }
   0x5   : > { %s1135_s27 = smov (%p28_p1, %s27_s27), 0  ;;  %p287_p3 = pnand %p810_p0, %p286_p2 }
   0x6   : > { %s813_s28 = sshll.u32 (!%p287_p3), %s918_s24, 9  ;;  %s811_s9 = sshll.u32 (!%p287_p3), %s918_s24, 2 }
   0x7   : > { %290 = sbr.rel (%p287_p3) target bundleno = 1159 (0x487), region = 44  ;;  %s995_s8 = scalar_lea.vmem (!%p287_p3), %s1124_s1, %s813_s28 }
   0x8   : > { %p1024_p4 = scmp.lt.s32.totalorder (!%p287_p3), %s811_s9, 7  ;;  %p814_p5 = scmp.ne.s32.totalorder (!%p287_p3), %s918_s24, 0 }
   0xc   : > { %v408_v0 = vld [vmem:[%s995_s8 + $0xf0] sm:$0xff]  ;;  %v409_v1 = vld [vmem:[%s995_s8 + $0xf8] sm:$0xff]  ;;  %v406_v11 = vld [vmem:[%s995_s8 + $0xe0] sm:$0xff]  ;;  %s1137_s9 = smov (!%p1024_p4, %s811_s9), 7 }
   0xd   : > { %v440_v2 = vld [vmem:[%s995_s8 + $0x1f0] sm:$0xff]  ;;  %v457_v3 = vpack.c.bf16 %v409_v1, %v408_v0  ;;  %v441_v4 = vld [vmem:[%s995_s8 + $0x1f8] sm:$0xff]  ;;  %v407_v13 = vld [vmem:[%s995_s8 + $0xe8] sm:$0xff]  ;;  %s812_s11 = sshll.u32 %s1137_s9, 3 }
   0xe   : > { %v392_v5 = vld [vmem:[%s995_s8 + $0x70] sm:$0xff]  ;;  %v393_v6 = vld [vmem:[%s995_s8 + $0x78] sm:$0xff]  ;;  %v473_v7 = vpack.c.bf16 %v441_v4, %v440_v2  ;;  %v438_v14 = vld [vmem:[%s995_s8 + $0x1e0] sm:$0xff]  ;;  %v456_v16 = vpack.c.bf16 %v407_v13, %v406_v11  ;;  %s1064_s14 = scalar_lea.vmem %s1123_s0, %s812_s11 }
   0xf   : > { %v449_v8 = vpack.c.bf16 %v393_v6, %v392_v5  ;;  %v424_v9 = vld [vmem:[%s995_s8 + $0x170] sm:$0xff]  ;;  %v425_v10 = vld [vmem:[%s995_s8 + $0x178] sm:$0xff]  ;;  %824 = vmatprep.subr.bf16.mxu0 %v457_v3  ;;  %v439_v15 = vld [vmem:[%s995_s8 + $0x1e8] sm:$0xff] }
  0x10   : > { %v465_v12 = vpack.c.bf16 %v425_v10, %v424_v9  ;;  %846 = vmatprep.subr.bf16.mxu1 %v473_v7  ;;  %v472_v17 = vpack.c.bf16 %v439_v15, %v438_v14  ;;  %v390_v18 = vld [vmem:[%s995_s8 + $0x60] sm:$0xff]  ;;  %v391_v19 = vld [vmem:[%s995_s8 + $0x68] sm:$0xff]  ;;  %v404_v23 = vld [vmem:[%s995_s8 + $0xd0] sm:$0xff] }
  0x11   : > { %825 = vmatpush3.bf16.msra.mxu0 %v449_v8  ;;  %v422_v20 = vld [vmem:[%s995_s8 + $0x160] sm:$0xff]  ;;  %v448_v21 = vpack.c.bf16 %v391_v19, %v390_v18  ;;  %v423_v22 = vld [vmem:[%s995_s8 + $0x168] sm:$0xff]  ;;  %v405_v24 = vld [vmem:[%s995_s8 + $0xd8] sm:$0xff] }
  0x12   : > { %847 = vmatpush3.bf16.msra.mxu1 %v465_v12  ;;  %826 = vmatprep.subr.bf16.mxu0 %v456_v16  ;;  %v464_v25 = vpack.c.bf16 %v423_v22, %v422_v20  ;;  %v455_v26 = vpack.c.bf16 %v405_v24, %v404_v23  ;;  %v436_v27 = vld [vmem:[%s995_s8 + $0x1d0] sm:$0xff]  ;;  %v437_v28 = vld [vmem:[%s995_s8 + $0x1d8] sm:$0xff]  ;;  %v402_v35 = vld [vmem:[%s995_s8 + $0xc0] sm:$0xff] }
  0x13   : > { %848 = vmatprep.subr.bf16.mxu1 %v472_v17  ;;  %v388_v29 = vld [vmem:[%s995_s8 + $0x50] sm:$0xff]  ;;  %v471_v30 = vpack.c.bf16 %v437_v28, %v436_v27  ;;  %v389_v31 = vld [vmem:[%s995_s8 + $0x58] sm:$0xff]  ;;  %v403_v36 = vld [vmem:[%s995_s8 + $0xc8] sm:$0xff] }
  0x14   : > { %v420_v32 = vld [vmem:[%s995_s8 + $0x150] sm:$0xff]  ;;  %v421_v33 = vld [vmem:[%s995_s8 + $0x158] sm:$0xff]  ;;  %v447_v34 = vpack.c.bf16 %v389_v31, %v388_v29  ;;  %v434_v37 = vld [vmem:[%s995_s8 + $0x1c0] sm:$0xff]  ;;  %v454_v39 = vpack.c.bf16 %v403_v36, %v402_v35 }
  0x15   : > { %827 = vmatpush3.bf16.msra.mxu0 %v448_v21  ;;  %v463_v38 = vpack.c.bf16 %v421_v33, %v420_v32  ;;  %v435_v40 = vld [vmem:[%s995_s8 + $0x1c8] sm:$0xff]  ;;  %v386_v41 = vld [vmem:[%s995_s8 + $0x40] sm:$0xff]  ;;  %v400_v46 = vld [vmem:[%s995_s8 + $0xb0] sm:$0xff] }
  0x16   : > { %849 = vmatpush3.bf16.msra.mxu1 %v464_v25  ;;  %828 = vmatprep.subr.bf16.mxu0 %v455_v26  ;;  %v387_v42 = vld [vmem:[%s995_s8 + $0x48] sm:$0xff]  ;;  %v470_v43 = vpack.c.bf16 %v435_v40, %v434_v37  ;;  %v418_v44 = vld [vmem:[%s995_s8 + $0x140] sm:$0xff]  ;;  %v401_v47 = vld [vmem:[%s995_s8 + $0xb8] sm:$0xff] }
  0x17   : > { %850 = vmatprep.subr.bf16.mxu1 %v471_v30  ;;  %v419_v45 = vld [vmem:[%s995_s8 + $0x148] sm:$0xff]  ;;  %v432_v48 = vld [vmem:[%s995_s8 + $0x1b0] sm:$0xff]  ;;  %v433_v49 = vld [vmem:[%s995_s8 + $0x1b8] sm:$0xff]  ;;  %v446_v50 = vpack.c.bf16 %v387_v42, %v386_v41  ;;  %v453_v52 = vpack.c.bf16 %v401_v47, %v400_v46 }
  0x18   : > { %v462_v51 = vpack.c.bf16 %v419_v45, %v418_v44  ;;  %v384_v53 = vld [vmem:[%s995_s8 + $0x30] sm:$0xff]  ;;  %v385_v54 = vld [vmem:[%s995_s8 + $0x38] sm:$0xff]  ;;  %v469_v56 = vpack.c.bf16 %v433_v49, %v432_v48  ;;  %v398_v58 = vld [vmem:[%s995_s8 + $0xa0] sm:$0xff] }
  0x19   : > { %829 = vmatpush3.bf16.msra.mxu0 %v447_v34  ;;  %v416_v55 = vld [vmem:[%s995_s8 + $0x130] sm:$0xff]  ;;  %v417_v57 = vld [vmem:[%s995_s8 + $0x138] sm:$0xff]  ;;  %v399_v59 = vld [vmem:[%s995_s8 + $0xa8] sm:$0xff]  ;;  %v445_v62 = vpack.c.bf16 %v385_v54, %v384_v53 }
  0x1a   : > { %851 = vmatpush3.bf16.msra.mxu1 %v463_v38  ;;  %830 = vmatprep.subr.bf16.mxu0 %v454_v39  ;;  %v430_v60 = vld [vmem:[%s995_s8 + $0x1a0] sm:$0xff]  ;;  %v431_v61 = vld [vmem:[%s995_s8 + $0x1a8] sm:$0xff]  ;;  %v461_v63 = vpack.c.bf16 %v417_v57, %v416_v55  ;;  %v452_v0 = vpack.c.bf16 %v399_v59, %v398_v58  ;;  %v396_v6 = vld [vmem:[%s995_s8 + $0x90] sm:$0xff] }
  0x1b   : > { %852 = vmatprep.subr.bf16.mxu1 %v470_v43  ;;  %v382_v1 = vld [vmem:[%s995_s8 + $0x20] sm:$0xff]  ;;  %v383_v2 = vld [vmem:[%s995_s8 + $0x28] sm:$0xff]  ;;  %v468_v4 = vpack.c.bf16 %v431_v61, %v430_v60  ;;  %v397_v7 = vld [vmem:[%s995_s8 + $0x98] sm:$0xff] }
  0x1c   : > { %v414_v3 = vld [vmem:[%s995_s8 + $0x120] sm:$0xff]  ;;  %v415_v5 = vld [vmem:[%s995_s8 + $0x128] sm:$0xff]  ;;  %v428_v8 = vld [vmem:[%s995_s8 + $0x190] sm:$0xff]  ;;  %v444_v10 = vpack.c.bf16 %v383_v2, %v382_v1  ;;  %v451_v14 = vpack.c.bf16 %v397_v7, %v396_v6 }
  0x1d   : > { %831 = vmatpush3.bf16.msra.mxu0 %v446_v50  ;;  %v429_v9 = vld [vmem:[%s995_s8 + $0x198] sm:$0xff]  ;;  %v380_v11 = vld [vmem:[%s995_s8 + $0x10] sm:$0xff]  ;;  %v460_v13 = vpack.c.bf16 %v415_v5, %v414_v3  ;;  %v369_v16 = vld [vmem:[%s1064_s14 + $0x8] sm:$0xff] }
  0x1e   : > { %853 = vmatpush3.bf16.msra.mxu1 %v462_v51  ;;  %832 = vmatprep.subr.bf16.mxu0 %v453_v52  ;;  %v381_v12 = vld [vmem:[%s995_s8 + $0x18] sm:$0xff]  ;;  %v412_v15 = vld [vmem:[%s995_s8 + $0x110] sm:$0xff]  ;;  %v467_v18 = vpack.c.bf16 %v429_v9, %v428_v8  ;;  %v394_v20 = vld [vmem:[%s995_s8 + $0x80] sm:$0xff]  ;;  %v373_v22 = vpack.c.bf16 %v369_v16, %v369_v16 }
  0x1f   : > { %854 = vmatprep.subr.bf16.mxu1 %v469_v56  ;;  %v371_v17 = vld [vmem:[%s1064_s14 + $0x18] sm:$0xff]  ;;  %v395_v21 = vld [vmem:[%s995_s8 + $0x88] sm:$0xff]  ;;  %v426_v24 = vld [vmem:[%s995_s8 + $0x180] sm:$0xff]  ;;  %v443_v26 = vpack.c.bf16 %v381_v12, %v380_v11 }
  0x20   : > { %v413_v19 = vld [vmem:[%s995_s8 + $0x118] sm:$0xff]  ;;  %v375_v23 = vpack.c.bf16 %v371_v17, %v371_v17  ;;  %v427_v25 = vld [vmem:[%s995_s8 + $0x188] sm:$0xff]  ;;  %506 = vmatprep.mubr.bf16.mxu0 %v373_v22  ;;  %v450_v28 = vpack.c.bf16 %v395_v21, %v394_v20  ;;  %v378_v29 = vld [vmem:[%s995_s8] sm:$0xff] }
  0x21   : > { %833 = vmatpush3.bf16.msra.mxu0 %v445_v62  ;;  %v459_v27 = vpack.c.bf16 %v413_v19, %v412_v15  ;;  %v379_v30 = vld [vmem:[%s995_s8 + $0x8] sm:$0xff]  ;;  %v466_v31 = vpack.c.bf16 %v427_v25, %v426_v24  ;;  %v410_v32 = vld [vmem:[%s995_s8 + $0x100] sm:$0xff]  ;;  %v370_v37 = vld [vmem:[%s1064_s14 + $0x10] sm:$0xff] }
  0x22   : > { %855 = vmatpush3.bf16.msra.mxu1 %v461_v63  ;;  %834 = vmatprep.subr.bf16.mxu0 %v452_v0  ;;  %v411_v33 = vld [vmem:[%s995_s8 + $0x108] sm:$0xff]  ;;  %v442_v34 = vpack.c.bf16 %v379_v30, %v378_v29  ;;  %v368_v35 = vld [vmem:[%s1064_s14] sm:$0xff]  ;;  %v374_v39 = vpack.c.bf16 %v370_v37, %v370_v37 }
  0x23   : > { %856 = vmatprep.subr.bf16.mxu1 %v468_v4  ;;  %546 = vmatprep.mubr.bf16.mxu1 %v375_v23  ;;  %v458_v36 = vpack.c.bf16 %v411_v33, %v410_v32  ;;  %v372_v38 = vpack.c.bf16 %v368_v35, %v368_v35 }
  0x25   : > { %835 = vmatpush3.bf16.msra.mxu0 %v444_v10 }
  0x26   : > { %857 = vmatpush3.bf16.msra.mxu1 %v460_v13  ;;  %836 = vmatprep.subr.bf16.mxu0 %v451_v14 }
  0x27   : > { %858 = vmatprep.subr.bf16.mxu1 %v467_v18 }
  0x29   : > { %837 = vmatpush3.bf16.msra.mxu0 %v443_v26 }
  0x2a   : > { %859 = vmatpush3.bf16.msra.mxu1 %v459_v27  ;;  %838 = vmatprep.subr.bf16.mxu0 %v450_v28 }
  0x2b   : > { %860 = vmatprep.subr.bf16.mxu1 %v466_v31 }
  0x2d   : > { %839 = vmatpush3.bf16.msra.mxu0 %v442_v34 }
  0x2e   : > { %861 = vmatpush3.bf16.msra.mxu1 %v458_v36 }
  0x30   : > { %507 = vmatmul.mubr.bf16.vlgmr.msra.gmra.mxu0 %v372_v38 }
  0x31   : > { %547 = vmatmul.mubr.bf16.vlgmr.msra.gmra.mxu1 %v374_v39 }
  0xf0   : > { %v840_v40 = vpop.f32.mrf.mxu0 }
  0xf1   : > { %v862_v41 = vpop.f32.mrf.mxu1 }
  0xf2   : > { %v841_v42 = vpop.f32.mrf.mxu0 }
  0xf3   : > { %v842_v43 = vadd.f32 %v841_v42, %v840_v40  ;;  %v863_v44 = vpop.f32.mrf.mxu1  ;;  %563 = sbr.rel (%p814_p5) target bundleno = 566 (0x236), region = 48 }
  0xf4   : > { %v864_v45 = vadd.f32 %v863_v44, %v862_v41  ;;  %v843_v46 = vpop.f32.mrf.mxu0 }
  0xf5   : > { %v865_v47 = vpop.f32.mrf.mxu1 }
  0xf6   : > { %v549_v48 = vadd.f32 %v864_v45, %v842_v43  ;;  %v844_v49 = vpop.f32.mrf.mxu0 }
  0xf7   : > { %v866_v50 = vpop.f32.mrf.mxu1 }
  0xf8   : > { %vm572_vm0 = vcmask 130048   ;;  %v574_v51 = vld [vmem:[%s1126_s3] sm:$0xff]  ;;  %v928_v55 = vmov 0   ;;  %v575_v60 = vlaneseq  ;;  %v929_v63 = vmov 0.0  }
  0xf9   : > { %v815_v52 = vld [vmem:[%s1125_s2] ss:$0 sm:$0xff]  ;;  %v584_v53 = vsel %vm572_vm0, %v574_v51, -inf  ;;  %895 = vset.pattern.permute.xlu0 %v928_v55  ;;  %vm602_vm2 = vcmask 7168  }
  0xfa   : > { %v571_v54 = vadd.f32 %v815_v52, %v549_v48  ;;  %585 = vmax.xlane.f32.xlu0 %v584_v53  ;;  %v577_v56 = vld [vmem:[%s1128_s5] sm:$0xff]  ;;  %v576_v61 = vand.u32 127, %v575_v60 }
  0xfc   : > { %573 = vst.msk [vmem:[#allocation2] sm:$0xff] %vm572_vm0, %v571_v54 }
 0x110   : > { %579 = vperm.xlu0 %895, %v577_v56  }
 0x183   : > { %v586_v57 = vpop.xlane.xlu0 %585 }
 0x184   : > { %v587_v58 = vsub.f32 %v574_v51, %v586_v57 }
 0x186   : > { %v588_v59 = vmul.f32 1.442695, %v587_v58 }
 0x188   : > { %896 = vpow2.f32 %v588_v59 }
 0x18b   : > { %v580_v62 = vpop.permute.xlu0 %579 }
 0x18c   : > { %vm581_vm1 = vcmp.eq.s32.totalorder %v576_v61, %v580_v62 }
 0x18d   : > { %v816_v0 = vsel %vm581_vm1, 1.0, %v929_v63 }
 0x18e   : > { %v596_v1 = vmul.f32 %v816_v0, %v574_v51 }
 0x190   : > { %v597_v4 = vsel %vm572_vm0, %v596_v1, 0.0 }
 0x195   : > { %v897_v2 = vpop.eup %896 }
 0x196   : > { %v590_v3 = vsel %vm572_vm0, %v897_v2, 0.0 }
 0x197   : > { %591 = vadd.xlane.f32.xlu1 %v590_v3 }
 0x19b   : > { %598 = vadd.xlane.f32.xlu1 %v597_v4 }
 0x220   : > { %v592_v5 = vpop.xlane.xlu1 %591 }
 0x221   : > { %898 = vlog2.f32 %v592_v5 }
 0x224   : > { %v599_v8 = vpop.xlane.xlu1 %598 }
 0x22e   : > { %v899_v6 = vpop.eup %898 }
 0x22f   : > { %v594_v7 = vmul.f32 0.6931472, %v899_v6 }
 0x231   : > { %v595_v9 = vadd.f32 %v594_v7, %v586_v57 }
 0x233   : > { %v600_v10 = vsub.f32 %v595_v9, %v599_v8 }
 0x235   : > { %603 = vst.msk [vmem:[%s1129_s6] sm:$0xff] %vm602_vm2, %v600_v10 }
 0x236 PF: > { %p817_p6 = scmp.eq.s32.totalorder %s918_s24, 0 }
 0x238   : > { %607 = sbr.rel (%p817_p6) target bundleno = 577 (0x241), region = 52 }
 0x23d   : > { %v608_v11 = vld [vmem:[#allocation2] sm:$0xff]  ;;  %vm610_vm3 = vcmask 130048  }
 0x23e   : > { %v609_v12 = vadd.f32 %v608_v11, %v549_v48 }
 0x240   : > { %611 = vst.msk [vmem:[#allocation2] sm:$0xff] %vm610_vm3, %v609_v12 }
 0x241 PF: > { %p818_p7 = scmp.ne.s32.totalorder %s918_s24, 1 }
 0x243   : > { %615 = sbr.rel (%p818_p7) target bundleno = 1159 (0x487), region = 56 }
 0x248   : > { %v616_v13 = vld [vmem:[#allocation2] sm:$0xff]  ;;  %vm619_vm4 = vcmask 130048   ;;  %v617_v17 = vlaneseq  ;;  %v930_v38 = vmov 0.0   ;;  %vm662_vm8 = vcmask 7168  }
 0x249   : > { %v643_v14 = vld [vmem:[%s1127_s4] sm:$0xff]  ;;  %v620_v15 = vsel %vm619_vm4, %v616_v13, -inf }
 0x24a   : > { %v644_v16 = vsel %vm619_vm4, %v643_v14, -inf  ;;  %621 = vmax.xlane.f32.xlu0 %v620_v15  ;;  %v618_v18 = vand.u32 127, %v617_v17 }
 0x24b   : > { %645 = vmax.xlane.f32.xlu1 %v644_v16 }
 0x2d3   : > { %v622_v19 = vpop.xlane.xlu0 %621 }
 0x2d4   : > { %v646_v20 = vpop.xlane.xlu1 %645  ;;  %vm623_vm5 = vcmp.ge.f32.partialorder %v616_v13, %v622_v19 }
 0x2d5   : > { %v647_v21 = vsub.f32 %v643_v14, %v646_v20  ;;  %v624_v22 = vsel %vm623_vm5, %v618_v18, 16 }
 0x2d6   : > { %v625_v23 = vsel %vm619_vm4, %v624_v22, 2147483647 }
 0x2d7   : > { %v648_v24 = vmul.f32 1.442695, %v647_v21  ;;  %v627_v25 = vshra.s32 %v625_v23, 16  ;;  %v626_v29 = vand.u32 65535, %v625_v23 }
 0x2d9   : > { %900 = vpow2.f32 %v648_v24  ;;  %v629_v26 = vcvt.s32.f32 %v627_v25  ;;  %v628_v31 = vcvt.s32.f32 %v626_v29 }
 0x2db   : > { %630 = vmin.xlane.f32.xlu0 %v629_v26 }
 0x2e6   : > { %v901_v27 = vpop.eup %900 }
 0x2e7   : > { %v650_v28 = vsel %vm619_vm4, %v901_v27, 0.0 }
 0x2e8   : > { %651 = vadd.xlane.f32.xlu0 %v650_v28 }
 0x364   : > { %v631_v30 = vpop.xlane.xlu0 %630 }
 0x365   : > { %vm632_vm6 = vcmp.eq.f32.partialorder %v629_v26, %v631_v30  ;;  %v637_v33 = vcvt.f32.s32 %v631_v30 }
 0x366   : > { %v633_v32 = vsel %vm632_vm6, %v628_v31, inf }
 0x367   : > { %634 = vmin.xlane.f32.xlu1 %v633_v32  ;;  %v638_v35 = vshll.u32 %v637_v33, 16 }
 0x371   : > { %v652_v42 = vpop.xlane.xlu0 %651 }
 0x372   : > { %902 = vlog2.f32 %v652_v42 }
 0x37f   : > { %v903_v43 = vpop.eup %902 }
 0x380   : > { %v654_v44 = vmul.f32 0.6931472, %v903_v43 }
 0x382   : > { %v655_v45 = vadd.f32 %v654_v44, %v646_v20 }
 0x3f0   : > { %v635_v34 = vpop.xlane.xlu1 %634 }
 0x3f1   : > { %v636_v36 = vcvt.f32.s32 %v635_v34 }
 0x3f3   : > { %v639_v37 = vadd.s32 %v638_v35, %v636_v36 }
 0x3f5   : > { %vm640_vm7 = vcmp.eq.s32.totalorder %v618_v18, %v639_v37 }
 0x3f6   : > { %v819_v39 = vsel %vm640_vm7, 1.0, %v930_v38 }
 0x3f7   : > { %v656_v40 = vmul.f32 %v819_v39, %v643_v14 }
 0x3f9   : > { %v657_v41 = vsel %vm619_vm4, %v656_v40, 0.0 }
 0x3fa   : > { %658 = vadd.xlane.f32.xlu1 %v657_v41 }
 0x483   : > { %v659_v46 = vpop.xlane.xlu1 %658 }
 0x484   : > { %v660_v47 = vsub.f32 %v655_v45, %v659_v46 }
 0x486   : > { %663 = vst.msk [vmem:[%s1130_s7] sm:$0xff] %vm662_vm8, %v660_v47 }
 0x487 PF: > { %s18_s26 = sadd.s32 1, %s926_s26   ;;  %s1132_s24 = smov %s922_s25 }
 0x488   : > { %p15_p8 = scmp.ge.s32.totalorder %s18_s26, 4   ;;  %s1133_s25 = smov %s1135_s27 }
 0x48a   :  { %17 = sbr.rel (!%p15_p8) target bundleno = 2 (0x2), region = 108 }

</bundles_post_ra>
